<compile_context>
chip_gen: v7x
topology: tpu7x:2x2x1
jax: 0.10.0
libtpu: 0.0.40
codegen_flags: <defaults>
</compile_context>

<pallas_src>
import functools

import jax
import jax.numpy as jnp
from jax.experimental import pallas as pl
from jax.experimental.pallas import tpu as pltpu


def _round_up(x, m):
    return ((x + m - 1) // m) * m


def _qkv_linear_kernel(x_ref, w_ref, b_ref, q_ref, kv_ref, *, qk_pad):
    # x_ref: (TM, dim)   w_ref: (dim, qk_pad + kv_pad)   b_ref: (1, qk_pad + kv_pad)
    # q_ref: (TM, qk_pad)   kv_ref: (TM, kv_pad)
    acc = jnp.dot(x_ref[...], w_ref[...], preferred_element_type=jnp.float32)
    y = acc + b_ref[...]                           # bias added in f32
    # qk_pad is a multiple of 128 -> both column slices are lane-tile aligned,
    # so these are plain vreg-aligned copies, no cross-lane shuffles.
    q_ref[...] = y[:, :qk_pad].astype(q_ref.dtype)
    kv_ref[...] = y[:, qk_pad:].astype(kv_ref.dtype)


def prepare_qkv_params(weight, bias, qk_dim, *, compute_dtype=None):
    """One-time parameter packing (run OUTSIDE the per-step hot path).

    weight: (2*qk_dim + dim, dim) in PyTorch nn.Linear layout; bias: (out_dim,).
    Returns packed, lane-dense-padded, already-transposed weight/bias.
    """
    out_dim, dim = weight.shape
    kv_dim = out_dim - qk_dim
    qk_pad = _round_up(qk_dim, 128)
    kv_pad = _round_up(kv_dim, 128)

    w_t = weight.T                                       # (dim, out_dim), done once
    w_q = jnp.pad(w_t[:, :qk_dim], ((0, 0), (0, qk_pad - qk_dim)))
    w_kv = jnp.pad(w_t[:, qk_dim:], ((0, 0), (0, kv_pad - kv_dim)))
    w_packed = jnp.concatenate([w_q, w_kv], axis=1)      # (dim, qk_pad + kv_pad)
    if compute_dtype is not None:
        w_packed = w_packed.astype(compute_dtype)        # e.g. bf16 on v6e/v7x

    b_q = jnp.pad(bias[:qk_dim], (0, qk_pad - qk_dim))
    b_kv = jnp.pad(bias[qk_dim:], (0, kv_pad - kv_dim))
    b_packed = jnp.concatenate([b_q, b_kv]).astype(jnp.float32)
    b_packed = b_packed.reshape(1, qk_pad + kv_pad)      # bias stays f32

    return dict(w_packed=w_packed, b_packed=b_packed, dim=dim,
                qk_dim=qk_dim, kv_dim=kv_dim, qk_pad=qk_pad, kv_pad=kv_pad,
                compute_dtype=compute_dtype)


def qkv_linear(x, params, *, tm=512, vmem_limit_bytes=64 * 1024 * 1024):
    """x: (B, N, dim) -> (q: (B, N, qk_dim), kv: (B, N, qk_dim + dim))."""
    B, N, dim = x.shape
    assert dim == params["dim"]
    qk_dim, kv_dim = params["qk_dim"], params["kv_dim"]
    qk_pad, kv_pad = params["qk_pad"], params["kv_pad"]
    out_pad = qk_pad + kv_pad
    w_packed, b_packed = params["w_packed"], params["b_packed"]

    out_dtype = x.dtype
    M = B * N
    x2 = x.reshape(M, dim)                               # free reshape (contiguous)
    if params["compute_dtype"] is not None:
        x2 = x2.astype(params["compute_dtype"])

    # Row tile: big enough to feed the MXU and amortise the ~0.35us per-step
    # overhead; multiple of 16 so f32 (8,128) and bf16 (16,128) sublane tiling
    # are both satisfied. No jnp.pad of x: pl.cdiv grid + Pallas masking handle
    # a ragged final block.
    tm_eff = max(16, min(tm, _round_up(M, 16)))
    grid = (pl.cdiv(M, tm_eff),)

    kernel = functools.partial(_qkv_linear_kernel, qk_pad=qk_pad)

    itemsize = jnp.dtype(x2.dtype).itemsize
    cost = pl.CostEstimate(
        flops=2 * M * dim * out_pad,
        transcendentals=0,
        bytes_accessed=(M * dim * itemsize
                        + dim * out_pad * jnp.dtype(w_packed.dtype).itemsize
                        + M * out_pad * jnp.dtype(out_dtype).itemsize),
    )

    def call(const_pipeline_mode):
        const_kw = ({} if const_pipeline_mode is None
                    else {"pipeline_mode": const_pipeline_mode})
        return pl.pallas_call(
            kernel,
            out_shape=(
                jax.ShapeDtypeStruct((M, qk_pad), out_dtype),
                jax.ShapeDtypeStruct((M, kv_pad), out_dtype),
            ),
            grid_spec=pltpu.PrefetchScalarGridSpec(
                num_scalar_prefetch=0,
                grid=grid,
                in_specs=[
                    pl.BlockSpec((tm_eff, dim), lambda i: (i, 0)),
                    # Constant index maps: weight/bias are DMA'd once and stay
                    # VMEM-resident; single buffering avoids holding a pointless
                    # second copy of the weight.
                    pl.BlockSpec((dim, out_pad), lambda i: (0, 0), **const_kw),
                    pl.BlockSpec((1, out_pad), lambda i: (0, 0), **const_kw),
                ],
                out_specs=[
                    pl.BlockSpec((tm_eff, qk_pad), lambda i: (i, 0)),
                    pl.BlockSpec((tm_eff, kv_pad), lambda i: (i, 0)),
                ],
            ),
            compiler_params=pltpu.CompilerParams(
                dimension_semantics=("parallel",),   # megacore split over tokens
                vmem_limit_bytes=vmem_limit_bytes,
            ),
            cost_estimate=cost,
        )(x2, w_packed, b_packed)

    try:
        q_p, kv_p = call(pl.Buffered(1))
    except Exception:
        # pipeline_mode unsupported on this JAX version -> default buffering.
        q_p, kv_p = call(None)

    # TODO(synk): for dim >~ 4k, add a K ("arbitrary") grid axis with a VMEM f32
    # accumulator (init/finalize via pl.when) instead of a fully resident weight.

    # Exact-width views; no-ops when qk_dim / kv_dim are already 128-multiples.
    q = (q_p if qk_pad == qk_dim else q_p[:, :qk_dim]).reshape(B, N, qk_dim)
    kv = (kv_p if kv_pad == kv_dim else kv_p[:, :kv_dim]).reshape(B, N, kv_dim)
    return q, kv


if __name__ == "__main__":
    # Small shapes consistent with the module's forward.
    B, N = 2, 8
    dim, qk_dim = 32, 16
    out_dim = qk_dim + qk_dim + dim

    key = jax.random.PRNGKey(0)
    kx, kw, kb = jax.random.split(key, 3)
    x = jax.random.normal(kx, (B, N, dim), dtype=jnp.float32)
    weight = jax.random.normal(kw, (out_dim, dim), dtype=jnp.float32) * 0.05
    bias = jax.random.normal(kb, (out_dim,), dtype=jnp.float32) * 0.01

    # f32 compute path (bit-accurate check vs reference).
    params = prepare_qkv_params(weight, bias, qk_dim)
    q, kv = qkv_linear(x, params)
    q = jax.block_until_ready(q)
    kv = jax.block_until_ready(kv)

    y_ref = x @ weight.T + bias
    q_ref, kv_ref = y_ref[..., :qk_dim], y_ref[..., qk_dim:]
    assert q.shape == (B, N, qk_dim) and kv.shape == (B, N, qk_dim + dim)
    assert jnp.allclose(q, q_ref, atol=1e-5, rtol=1e-5)
    assert jnp.allclose(kv, kv_ref, atol=1e-5, rtol=1e-5)

    # bf16 compute path (recommended on v6e/v7x): looser tolerance.
    params_bf16 = prepare_qkv_params(weight, bias, qk_dim,
                                     compute_dtype=jnp.bfloat16)
    q16, kv16 = qkv_linear(x, params_bf16)
    q16 = jax.block_until_ready(q16)
    kv16 = jax.block_until_ready(kv16)
    assert jnp.allclose(q16, q_ref, atol=5e-2, rtol=5e-2)
    assert jnp.allclose(kv16, kv_ref, atol=5e-2, rtol=5e-2)

    print("KERNEL_OK")
</pallas_src>

<mosaic_0001>
module attributes {stable_mosaic.version = 11 : i64} {
  func.func @_qkv_linear_kernel(%arg0: i32, %arg1: memref<16x32xf32, #tpu.memory_space<vmem>>, %arg2: memref<32x256xf32, #tpu.memory_space<vmem>>, %arg3: memref<1x256xf32, #tpu.memory_space<vmem>>, %arg4: memref<16x128xf32, #tpu.memory_space<vmem>>, %arg5: memref<16x128xf32, #tpu.memory_space<vmem>>) attributes {dimension_semantics = [#tpu.dimension_semantics<parallel>], iteration_bounds = array<i64: 1>, scalar_prefetch = 0 : i64, scratch_operands = 0 : i64, tpu.core_type = #tpu.core_type<tc>, window_params = [{transform_indices = @transform_0, window_bounds = array<i64: 16, 32>}, {pipeline_mode = #tpu.pipeline_mode<synchronous>, transform_indices = @transform_1, window_bounds = array<i64: 32, 256>}, {pipeline_mode = #tpu.pipeline_mode<synchronous>, transform_indices = @transform_2, window_bounds = array<i64: 1, 256>}, {transform_indices = @transform_3, window_bounds = array<i64: 16, 128>}, {transform_indices = @transform_4, window_bounds = array<i64: 16, 128>}]} {
    %c0 = arith.constant 0 : index
    %c0_0 = arith.constant 0 : index
    %0 = vector.load %arg1[%c0, %c0_0] : memref<16x32xf32, #tpu.memory_space<vmem>>, vector<16x32xf32>
    %c0_1 = arith.constant 0 : index
    %c0_2 = arith.constant 0 : index
    %1 = vector.load %arg2[%c0_1, %c0_2] : memref<32x256xf32, #tpu.memory_space<vmem>>, vector<32x256xf32>
    %cst = arith.constant dense<0.000000e+00> : vector<16x256xf32>
    %2 = tpu.matmul %0, %1, %cst {dimension_numbers = #tpu.dot_dimension_numbers<[1], [0], [0], [1], [0, 0, 1, 1], [], []>} : vector<16x32xf32>, vector<32x256xf32>, vector<16x256xf32> -> vector<16x256xf32>
    %c0_3 = arith.constant 0 : index
    %c0_4 = arith.constant 0 : index
    %3 = vector.load %arg3[%c0_3, %c0_4] : memref<1x256xf32, #tpu.memory_space<vmem>>, vector<1x256xf32>
    %4 = vector.broadcast %3 : vector<1x256xf32> to vector<16x256xf32>
    %5 = arith.addf %2, %4 : vector<16x256xf32>
    %6 = vector.extract_strided_slice %5 {offsets = [0, 0], sizes = [16, 128], strides = [1, 1]} : vector<16x256xf32> to vector<16x128xf32>
    %c0_5 = arith.constant 0 : index
    %c0_6 = arith.constant 0 : index
    %7 = vector.load %arg4[%c0_5, %c0_6] : memref<16x128xf32, #tpu.memory_space<vmem>>, vector<16x128xf32>
    tpu.vector_store %arg4[%c0_5, %c0_6], %6 {strides = array<i32>} : memref<16x128xf32, #tpu.memory_space<vmem>>, vector<16x128xf32>,
    %8 = vector.extract_strided_slice %5 {offsets = [0, 128], sizes = [16, 128], strides = [1, 1]} : vector<16x256xf32> to vector<16x128xf32>
    %c0_7 = arith.constant 0 : index
    %c0_8 = arith.constant 0 : index
    %9 = vector.load %arg5[%c0_7, %c0_8] : memref<16x128xf32, #tpu.memory_space<vmem>>, vector<16x128xf32>
    tpu.vector_store %arg5[%c0_7, %c0_8], %8 {strides = array<i32>} : memref<16x128xf32, #tpu.memory_space<vmem>>, vector<16x128xf32>,
    return
  }
  func.func @transform_0(%arg0: i32) -> (i32, i32) {
    %c0_i32 = arith.constant 0 : i32
    %c0_i32_0 = arith.constant 0 : i32
    return %arg0, %c0_i32 : i32, i32
  }
  func.func @transform_1(%arg0: i32) -> (i32, i32) {
    %c0_i32 = arith.constant 0 : i32
    %c0_i32_0 = arith.constant 0 : i32
    %c0_i32_1 = arith.constant 0 : i32
    return %c0_i32, %c0_i32_0 : i32, i32
  }
  func.func @transform_2(%arg0: i32) -> (i32, i32) {
    %c0_i32 = arith.constant 0 : i32
    %c0_i32_0 = arith.constant 0 : i32
    %c0_i32_1 = arith.constant 0 : i32
    return %c0_i32, %c0_i32_0 : i32, i32
  }
  func.func @transform_3(%arg0: i32) -> (i32, i32) {
    %c0_i32 = arith.constant 0 : i32
    %c0_i32_0 = arith.constant 0 : i32
    return %arg0, %c0_i32 : i32, i32
  }
  func.func @transform_4(%arg0: i32) -> (i32, i32) {
    %c0_i32 = arith.constant 0 : i32
    %c0_i32_0 = arith.constant 0 : i32
    return %arg0, %c0_i32 : i32, i32
  }
}

module attributes {stable_mosaic.version = 11 : i64} {
  func.func @_qkv_linear_kernel(%arg0: i32, %arg1: memref<16x32xf32, #tpu.memory_space<vmem>>, %arg2: memref<32x256xf32, #tpu.memory_space<vmem>>, %arg3: memref<1x256xf32, #tpu.memory_space<vmem>>, %arg4: memref<16x128xf32, #tpu.memory_space<vmem>>, %arg5: memref<16x128xf32, #tpu.memory_space<vmem>>) attributes {dimension_semantics = [#tpu.dimension_semantics<parallel>], iteration_bounds = array<i64: 1>, scalar_prefetch = 0 : i64, scratch_operands = 0 : i64, tpu.core_type = #tpu.core_type<tc>, window_params = [{transform_indices = @transform_0, window_bounds = array<i64: 16, 32>}, {pipeline_mode = #tpu.pipeline_mode<synchronous>, transform_indices = @transform_1, window_bounds = array<i64: 32, 256>}, {pipeline_mode = #tpu.pipeline_mode<synchronous>, transform_indices = @transform_2, window_bounds = array<i64: 1, 256>}, {transform_indices = @transform_3, window_bounds = array<i64: 16, 128>}, {transform_indices = @transform_4, window_bounds = array<i64: 16, 128>}]} {
    %c0 = arith.constant 0 : index
    %c0_0 = arith.constant 0 : index
    %0 = vector.load %arg1[%c0, %c0_0] : memref<16x32xf32, #tpu.memory_space<vmem>>, vector<16x32xf32>
    %c0_1 = arith.constant 0 : index
    %c0_2 = arith.constant 0 : index
    %1 = vector.load %arg2[%c0_1, %c0_2] : memref<32x256xf32, #tpu.memory_space<vmem>>, vector<32x256xf32>
    %cst = arith.constant dense<0.000000e+00> : vector<16x256xf32>
    %2 = tpu.matmul %0, %1, %cst {dimension_numbers = #tpu.dot_dimension_numbers<[1], [0], [0], [1], [0, 0, 1, 1], [], []>} : vector<16x32xf32>, vector<32x256xf32>, vector<16x256xf32> -> vector<16x256xf32>
    %c0_3 = arith.constant 0 : index
    %c0_4 = arith.constant 0 : index
    %3 = vector.load %arg3[%c0_3, %c0_4] : memref<1x256xf32, #tpu.memory_space<vmem>>, vector<1x256xf32>
    %4 = vector.broadcast %3 : vector<1x256xf32> to vector<16x256xf32>
    %5 = arith.addf %2, %4 : vector<16x256xf32>
    %6 = vector.extract_strided_slice %5 {offsets = [0, 0], sizes = [16, 128], strides = [1, 1]} : vector<16x256xf32> to vector<16x128xf32>
    %c0_5 = arith.constant 0 : index
    %c0_6 = arith.constant 0 : index
    %7 = vector.load %arg4[%c0_5, %c0_6] : memref<16x128xf32, #tpu.memory_space<vmem>>, vector<16x128xf32>
    tpu.vector_store %arg4[%c0_5, %c0_6], %6 {strides = array<i32>} : memref<16x128xf32, #tpu.memory_space<vmem>>, vector<16x128xf32>,
    %8 = vector.extract_strided_slice %5 {offsets = [0, 128], sizes = [16, 128], strides = [1, 1]} : vector<16x256xf32> to vector<16x128xf32>
    %c0_7 = arith.constant 0 : index
    %c0_8 = arith.constant 0 : index
    %9 = vector.load %arg5[%c0_7, %c0_8] : memref<16x128xf32, #tpu.memory_space<vmem>>, vector<16x128xf32>
    tpu.vector_store %arg5[%c0_7, %c0_8], %8 {strides = array<i32>} : memref<16x128xf32, #tpu.memory_space<vmem>>, vector<16x128xf32>,
    return
  }
  func.func @transform_0(%arg0: i32) -> (i32, i32) {
    %c0_i32 = arith.constant 0 : i32
    %c0_i32_0 = arith.constant 0 : i32
    return %arg0, %c0_i32 : i32, i32
  }
  func.func @transform_1(%arg0: i32) -> (i32, i32) {
    %c0_i32 = arith.constant 0 : i32
    %c0_i32_0 = arith.constant 0 : i32
    %c0_i32_1 = arith.constant 0 : i32
    return %c0_i32, %c0_i32_0 : i32, i32
  }
  func.func @transform_2(%arg0: i32) -> (i32, i32) {
    %c0_i32 = arith.constant 0 : i32
    %c0_i32_0 = arith.constant 0 : i32
    %c0_i32_1 = arith.constant 0 : i32
    return %c0_i32, %c0_i32_0 : i32, i32
  }
  func.func @transform_3(%arg0: i32) -> (i32, i32) {
    %c0_i32 = arith.constant 0 : i32
    %c0_i32_0 = arith.constant 0 : i32
    return %arg0, %c0_i32 : i32, i32
  }
  func.func @transform_4(%arg0: i32) -> (i32, i32) {
    %c0_i32 = arith.constant 0 : i32
    %c0_i32_0 = arith.constant 0 : i32
    return %arg0, %c0_i32 : i32, i32
  }
}

</mosaic_0001>

<bundles_post_ra>
// kernel: tpu_custom_call.1
= control target key start
LH: loop header
LB: loop body
LE: loop exit
PB: predicated region body
PF: predicated region fallthrough
CT: control target
= control target key end

     0   :  { %10 = vsyncpa [#allocation3], 0  ;;  %s454_s0 = inlined_call_operand.hbm [shape: f32[16,32], index: 0, kind: input, shape index: {}]   ;;  %s455_s1 = inlined_call_operand.hbm [shape: f32[32,256], index: 1, kind: input, shape index: {}]   ;;  %s456_s2 = inlined_call_operand.hbm [shape: f32[1,256], index: 2, kind: input, shape index: {}]   ;;  %s457_s3 = inlined_call_operand.hbm [shape: f32[16,128], index: 3, kind: output, shape index: {0}]   ;;  %s458_s4 = inlined_call_operand.hbm [shape: f32[16,128], index: 4, kind: output, shape index: {1}]  }
   0x1   :  { %11 = vsyncpa [#allocation6], 0 }
   0x2   :  { %12 = vsyncpa [#allocation4], 0 }
   0x3   :  { %13 = vsyncpa [#allocation10], 0  ;;  %s343_s15 = smov [#allocation5]   ;;  %s225_s19 = scalar_lea.hbm %s455_s1, 1024 }
   0x4   :  { %s31_s16 = sshll.u32 %s343_s15, 4  ;;  %p226_p0 = scmp.ne.s32.totalorder %s455_s1, %s225_s19  ;;  %s32_s16 = int_to_ptr.vmem [resolvable:$true] %s31_s16 }
   0x5   :  { %p229_p1 = scmp.lt.u32.totalorder %s225_s19, %s455_s1 }
   0x7   :  { %p231_p2 = pnand %p229_p1, %p226_p0 }
   0x9   :  { %234 = shalt.err (!%p231_p2)
}
   0xa   :  { %s235_s24 = scalar_lea.vmem %s32_s16, 1024  ;;  %p240_p4 = scmp.lt.s32.totalorder %s32_s16, %s32_s16 }
   0xb   :  { %p236_p3 = scmp.ne.s32.totalorder %s32_s16, %s235_s24  ;;  %p241_p5 = scmp.lt.s32.totalorder %s235_s24, %s235_s24 }
   0xd   :  { %p242_p6 = por %p241_p5, %p240_p4 }
   0xf   :  { %p243_p7 = pnand %p242_p6, %p236_p3 }
  0x11   :  { %246 = shalt.err (!%p243_p7)
}
  0x12   :  { %s344_s25 = smov 256   ;;  %s345_s26 = smov 16  }
  0x13   :  { %37 = dma.hbm_to_vmem [thread:$0]  %s455_s1, 1024, %s32_s16, [#allocation6], %s344_s25, %s344_s25, %s345_s26  }
  0x14   :  { %s346_s29 = smov [#allocation2]   ;;  %s247_s7 = scalar_lea.hbm %s454_s0, 256 }
  0x15   :  { %s19_s30 = sshll.u32 %s346_s29, 4  ;;  %p248_p8 = scmp.ne.s32.totalorder %s454_s0, %s247_s7  ;;  %s20_s30 = int_to_ptr.vmem [resolvable:$true] %s19_s30 }
  0x16   :  { %p251_p9 = scmp.lt.u32.totalorder %s247_s7, %s454_s0 }
  0x18   :  { %p253_p10 = pnand %p251_p9, %p248_p8 }
  0x1a   :  { %256 = shalt.err (!%p253_p10)
}
  0x1b   :  { %s257_s12 = scalar_lea.vmem %s20_s30, 256  ;;  %p262_p12 = scmp.lt.s32.totalorder %s20_s30, %s20_s30 }
  0x1c   :  { %p258_p11 = scmp.ne.s32.totalorder %s20_s30, %s257_s12  ;;  %p263_p13 = scmp.lt.s32.totalorder %s257_s12, %s257_s12 }
  0x1e   :  { %p264_p0 = por %p263_p13, %p262_p12 }
  0x20   :  { %p265_p1 = pnand %p264_p0, %p258_p11 }
  0x22   :  { %268 = shalt.err (!%p265_p1)
}
  0x23   :  { %s347_s1 = smov 128   ;;  %s348_s13 = smov 8  }
  0x24   :  { %25 = dma.hbm_to_vmem [thread:$0]  %s454_s0, 256, %s20_s30, [#allocation3], %s347_s1, %s347_s1, %s348_s13  }
  0x25   :  { %s349_s16 = smov [#allocation7]   ;;  %s269_s20 = scalar_lea.hbm %s456_s2, 32 }
  0x26   :  { %s44_s17 = sshll.u32 %s349_s16, 4  ;;  %p270_p2 = scmp.ne.s32.totalorder %s456_s2, %s269_s20  ;;  %s45_s17 = int_to_ptr.vmem [resolvable:$true] %s44_s17 }
  0x27   :  { %p273_p3 = scmp.lt.u32.totalorder %s269_s20, %s456_s2 }
  0x29   :  { %p275_p4 = pnand %p273_p3, %p270_p2 }
  0x2b   :  { %278 = shalt.err (!%p275_p4)
}
  0x2c   :  { %s279_s25 = scalar_lea.vmem %s45_s17, 32  ;;  %p284_p6 = scmp.lt.s32.totalorder %s45_s17, %s45_s17 }
  0x2d   :  { %p280_p5 = scmp.ne.s32.totalorder %s45_s17, %s279_s25  ;;  %p285_p7 = scmp.lt.s32.totalorder %s279_s25, %s279_s25 }
  0x2f   :  { %p286_p8 = por %p285_p7, %p284_p6 }
  0x31   :  { %p287_p9 = pnand %p286_p8, %p280_p5 }
  0x33   :  { %290 = shalt.err (!%p287_p9)
}
  0x34   :  { %47 = dma.hbm_to_vmem [thread:$0]  %s456_s2, 32, %s45_s17, [#allocation6]  }
  0x35   :  { %335 = dma.done.wait [#allocation3], 256  }
  0x36   :  { %336 = vsyncadd [#allocation3], 4294967040 }
  0x37   :  { %337 = dma.done.wait [#allocation6], 1056  }
  0x38   :  { %338 = vsyncadd [#allocation6], 4294966240  ;;  %v350_v0 = vmov 0.0   ;;  %v60_v1 = vld [vmem:[#allocation5 + $0x8] sm:$0xff]  ;;  %v62_v2 = vld [vmem:[#allocation5 + $0x18] sm:$0xff]  ;;  %vm79_vm0 = vcmask 261120   ;;  %v69_v15 = vlaneseq }
  0x39   :  { %150 = vmatprep.mubr.f32.mxu0 %v350_v0  ;;  %156 = vmatprep.mubr.f32.mxu1 %v350_v0  ;;  %v59_v3 = vld [vmem:[#allocation5] sm:$0xff]  ;;  %v203_v4 = vpack.c.bf16 %v62_v2, %v60_v1  ;;  %v61_v5 = vld [vmem:[#allocation5 + $0x10] sm:$0xff]  ;;  %v64_v6 = vld [vmem:[#allocation5 + $0x28] sm:$0xff]  ;;  %s351_s2 = smov [#allocation8]   ;;  %s352_s28 = smov [#allocation9]  }
  0x3a   :  { %v66_v7 = vld [vmem:[#allocation5 + $0x38] sm:$0xff]  ;;  %v205_v8 = vpack.c.bf16 %v61_v5, %v59_v3  ;;  %v63_v10 = vld [vmem:[#allocation5 + $0x20] sm:$0xff]  ;;  %v65_v11 = vld [vmem:[#allocation5 + $0x30] sm:$0xff]  ;;  %v70_v16 = vshrl.u32 %v69_v15, 7  ;;  %s172_s27 = sshll.u32 %s351_s2, 4  ;;  %s184_s29 = sshll.u32 %s352_s28, 4  ;;  %s173_s27 = int_to_ptr.vmem [resolvable:$true] %s172_s27  ;;  %s417_s29 = int_to_ptr.vmem [resolvable:$true] %s184_s29 }
  0x3b   :  { %v207_v9 = vpack.c.bf16 %v66_v7, %v64_v6  ;;  %204 = vmatprep.subr.bf16.mxu0 %v203_v4  ;;  %211 = vmatprep.subr.bf16.mxu1 %v203_v4  ;;  %v209_v12 = vpack.c.bf16 %v65_v11, %v63_v10  ;;  %v57_v13 = vld [vmem:[#allocation2] sm:$0xff]  ;;  %v58_v14 = vld [vmem:[#allocation2 + $0x8] sm:$0xff]  ;;  %v67_v18 = vld [vmem:[#allocation7] sm:$0x3]  ;;  %s291_s30 = scalar_lea.vmem %s173_s27, 256  ;;  %p296_p11 = scmp.lt.s32.totalorder %s173_s27, %s173_s27 }
  0x3c   :  { %206 = vmatpush1.bf16.msra.mxu0 %v205_v8  ;;  %213 = vmatpush1.bf16.msra.mxu1 %v205_v8  ;;  %v71_v17 = vsub.s32 0, %v70_v16  ;;  %v75_v19 = vsub.s32 1, %v70_v16  ;;  %p292_p10 = scmp.ne.s32.totalorder %s173_s27, %s291_s30  ;;  %p297_p12 = scmp.lt.s32.totalorder %s291_s30, %s291_s30 }
  0x3d   :  { %208 = vmatprep.subr.bf16.mxu0 %v207_v9  ;;  %212 = vmatprep.subr.bf16.mxu1 %v207_v9 }
  0x3e   :  { %v72_v20 = vrot.slane %v67_v18, %v71_v17  ;;  %v76_v21 = vrot.slane %v67_v18, %v75_v19  ;;  %p298_p13 = por %p297_p12, %p296_p11 }
  0x40   :  { %210 = vmatpush1.bf16.msra.mxu0 %v209_v12  ;;  %214 = vmatpush1.bf16.msra.mxu1 %v209_v12  ;;  %p299_p0 = pnand %p298_p13, %p292_p10 }
  0x43   :  { %201 = vmatmul.mubr.msk.f32.vlgmr.msra.gmra.mrb[0].mxu0 %vm79_vm0, %v57_v13  ;;  %202 = vmatmul.mubr.msk.f32.vlgmr.msra.gmra.mrb[0].mxu1 %vm79_vm0, %v58_v14 }
 0x116   :  { %v152_v22 = vpop.f32.mrb[0].mxu0  ;;  %v158_v23 = vpop.f32.mrb[0].mxu1 }
 0x117   :  { %v153_v24 = vadd.f32 %v152_v22, %v72_v20  ;;  %v159_v25 = vadd.f32 %v158_v23, %v72_v20  ;;  %v154_v26 = vpop.f32.mrb[1].mxu0  ;;  %v160_v27 = vpop.f32.mrb[1].mxu1 }
 0x118   :  { %v155_v28 = vadd.f32 %v154_v26, %v76_v21  ;;  %v161_v29 = vadd.f32 %v160_v27, %v76_v21 }
 0x119   :  { %163 = vst [vmem:[#allocation8] sm:$0xff] %v153_v24  ;;  %164 = vst [vmem:[#allocation8 + $0x8] sm:$0xff] %v159_v25 }
 0x11a   :  { %165 = vst [vmem:[#allocation9] sm:$0xff] %v155_v28  ;;  %166 = vst [vmem:[#allocation9 + $0x8] sm:$0xff] %v161_v29 }
 0x11b   :  { %302 = shalt.err (!%p299_p0)
}
 0x11c   :  { %s303_s7 = scalar_lea.hbm %s457_s3, 256 }
 0x11d   :  { %p304_p1 = scmp.ne.s32.totalorder %s457_s3, %s303_s7  ;;  %p307_p2 = scmp.lt.u32.totalorder %s303_s7, %s457_s3 }
 0x11f   :  { %p309_p3 = pnand %p307_p2, %p304_p1 }
 0x121   :  { %312 = shalt.err (!%p309_p3)
}
 0x122   :  { %178 = dma.vmem_to_hbm [thread:$0]  %s173_s27, 256, %s457_s3, [#allocation4], %s347_s1, %s347_s1, %s348_s13  }
 0x123   :  { %s313_s15 = scalar_lea.vmem %s417_s29, 256  ;;  %p318_p5 = scmp.lt.s32.totalorder %s417_s29, %s417_s29 }
 0x124   :  { %p314_p4 = scmp.ne.s32.totalorder %s417_s29, %s313_s15  ;;  %p319_p6 = scmp.lt.s32.totalorder %s313_s15, %s313_s15 }
 0x126   :  { %p320_p7 = por %p319_p6, %p318_p5 }
 0x128   :  { %p321_p8 = pnand %p320_p7, %p314_p4 }
 0x12a   :  { %324 = shalt.err (!%p321_p8)
}
 0x12b   :  { %s325_s18 = scalar_lea.hbm %s458_s4, 256 }
 0x12c   :  { %p326_p9 = scmp.ne.s32.totalorder %s458_s4, %s325_s18  ;;  %p329_p10 = scmp.lt.u32.totalorder %s325_s18, %s458_s4 }
 0x12e   :  { %p331_p11 = pnand %p329_p10, %p326_p9 }
 0x130   :  { %334 = shalt.err (!%p331_p11)
}
 0x131   :  { %190 = dma.vmem_to_hbm [thread:$0]  %s417_s29, 256, %s458_s4, [#allocation10], %s347_s1, %s347_s1, %s348_s13  }
 0x132   :  { %339 = dma.done.wait [#allocation4], 256  }
 0x133   :  { %340 = vsyncadd [#allocation4], 4294967040 }
 0x134   :  { %341 = dma.done.wait [#allocation10], 256  }
 0x135   :  { %342 = vsyncadd [#allocation10], 4294967040 }
 0x136   :  { %197 = vsyncpa [#allocation3], 1 }
 0x137   :  { %198 = vsyncpa [#allocation6], 1 }
 0x138   :  { %199 = vsyncpa [#allocation4], 1 }
 0x139   :  { %200 = vsyncpa [#allocation10], 1 }

// kernel: tpu_custom_call.1
= control target key start
LH: loop header
LB: loop body
LE: loop exit
PB: predicated region body
PF: predicated region fallthrough
CT: control target
= control target key end

     0   :  { %10 = vsyncpa [#allocation3], 0  ;;  %s454_s0 = inlined_call_operand.hbm [shape: f32[16,32], index: 0, kind: input, shape index: {}]   ;;  %s455_s1 = inlined_call_operand.hbm [shape: f32[32,256], index: 1, kind: input, shape index: {}]   ;;  %s456_s2 = inlined_call_operand.hbm [shape: f32[1,256], index: 2, kind: input, shape index: {}]   ;;  %s457_s3 = inlined_call_operand.hbm [shape: f32[16,128], index: 3, kind: output, shape index: {0}]   ;;  %s458_s4 = inlined_call_operand.hbm [shape: f32[16,128], index: 4, kind: output, shape index: {1}]  }
   0x1   :  { %11 = vsyncpa [#allocation6], 0 }
   0x2   :  { %12 = vsyncpa [#allocation4], 0 }
   0x3   :  { %13 = vsyncpa [#allocation10], 0  ;;  %s343_s15 = smov [#allocation5]   ;;  %s225_s19 = scalar_lea.hbm %s455_s1, 1024 }
   0x4   :  { %s31_s16 = sshll.u32 %s343_s15, 4  ;;  %p226_p0 = scmp.ne.s32.totalorder %s455_s1, %s225_s19  ;;  %s32_s16 = int_to_ptr.vmem [resolvable:$true] %s31_s16 }
   0x5   :  { %p229_p1 = scmp.lt.u32.totalorder %s225_s19, %s455_s1 }
   0x7   :  { %p231_p2 = pnand %p229_p1, %p226_p0 }
   0x9   :  { %234 = shalt.err (!%p231_p2)
}
   0xa   :  { %s235_s24 = scalar_lea.vmem %s32_s16, 1024  ;;  %p240_p4 = scmp.lt.s32.totalorder %s32_s16, %s32_s16 }
   0xb   :  { %p236_p3 = scmp.ne.s32.totalorder %s32_s16, %s235_s24  ;;  %p241_p5 = scmp.lt.s32.totalorder %s235_s24, %s235_s24 }
   0xd   :  { %p242_p6 = por %p241_p5, %p240_p4 }
   0xf   :  { %p243_p7 = pnand %p242_p6, %p236_p3 }
  0x11   :  { %246 = shalt.err (!%p243_p7)
}
  0x12   :  { %s344_s25 = smov 256   ;;  %s345_s26 = smov 16  }
  0x13   :  { %37 = dma.hbm_to_vmem [thread:$0]  %s455_s1, 1024, %s32_s16, [#allocation6], %s344_s25, %s344_s25, %s345_s26  }
  0x14   :  { %s346_s29 = smov [#allocation2]   ;;  %s247_s7 = scalar_lea.hbm %s454_s0, 256 }
  0x15   :  { %s19_s30 = sshll.u32 %s346_s29, 4  ;;  %p248_p8 = scmp.ne.s32.totalorder %s454_s0, %s247_s7  ;;  %s20_s30 = int_to_ptr.vmem [resolvable:$true] %s19_s30 }
  0x16   :  { %p251_p9 = scmp.lt.u32.totalorder %s247_s7, %s454_s0 }
  0x18   :  { %p253_p10 = pnand %p251_p9, %p248_p8 }
  0x1a   :  { %256 = shalt.err (!%p253_p10)
}
  0x1b   :  { %s257_s12 = scalar_lea.vmem %s20_s30, 256  ;;  %p262_p12 = scmp.lt.s32.totalorder %s20_s30, %s20_s30 }
  0x1c   :  { %p258_p11 = scmp.ne.s32.totalorder %s20_s30, %s257_s12  ;;  %p263_p13 = scmp.lt.s32.totalorder %s257_s12, %s257_s12 }
  0x1e   :  { %p264_p0 = por %p263_p13, %p262_p12 }
  0x20   :  { %p265_p1 = pnand %p264_p0, %p258_p11 }
  0x22   :  { %268 = shalt.err (!%p265_p1)
}
  0x23   :  { %s347_s1 = smov 128   ;;  %s348_s13 = smov 8  }
  0x24   :  { %25 = dma.hbm_to_vmem [thread:$0]  %s454_s0, 256, %s20_s30, [#allocation3], %s347_s1, %s347_s1, %s348_s13  }
  0x25   :  { %s349_s16 = smov [#allocation7]   ;;  %s269_s20 = scalar_lea.hbm %s456_s2, 32 }
  0x26   :  { %s44_s17 = sshll.u32 %s349_s16, 4  ;;  %p270_p2 = scmp.ne.s32.totalorder %s456_s2, %s269_s20  ;;  %s45_s17 = int_to_ptr.vmem [resolvable:$true] %s44_s17 }
  0x27   :  { %p273_p3 = scmp.lt.u32.totalorder %s269_s20, %s456_s2 }
  0x29   :  { %p275_p4 = pnand %p273_p3, %p270_p2 }
  0x2b   :  { %278 = shalt.err (!%p275_p4)
}
  0x2c   :  { %s279_s25 = scalar_lea.vmem %s45_s17, 32  ;;  %p284_p6 = scmp.lt.s32.totalorder %s45_s17, %s45_s17 }
  0x2d   :  { %p280_p5 = scmp.ne.s32.totalorder %s45_s17, %s279_s25  ;;  %p285_p7 = scmp.lt.s32.totalorder %s279_s25, %s279_s25 }
  0x2f   :  { %p286_p8 = por %p285_p7, %p284_p6 }
  0x31   :  { %p287_p9 = pnand %p286_p8, %p280_p5 }
  0x33   :  { %290 = shalt.err (!%p287_p9)
}
  0x34   :  { %47 = dma.hbm_to_vmem [thread:$0]  %s456_s2, 32, %s45_s17, [#allocation6]  }
  0x35   :  { %335 = dma.done.wait [#allocation3], 256  }
  0x36   :  { %336 = vsyncadd [#allocation3], 4294967040 }
  0x37   :  { %337 = dma.done.wait [#allocation6], 1056  }
  0x38   :  { %338 = vsyncadd [#allocation6], 4294966240  ;;  %v350_v0 = vmov 0.0   ;;  %v60_v1 = vld [vmem:[#allocation5 + $0x8] sm:$0xff]  ;;  %v62_v2 = vld [vmem:[#allocation5 + $0x18] sm:$0xff]  ;;  %vm79_vm0 = vcmask 261120   ;;  %v69_v15 = vlaneseq }
  0x39   :  { %150 = vmatprep.mubr.f32.mxu0 %v350_v0  ;;  %156 = vmatprep.mubr.f32.mxu1 %v350_v0  ;;  %v59_v3 = vld [vmem:[#allocation5] sm:$0xff]  ;;  %v203_v4 = vpack.c.bf16 %v62_v2, %v60_v1  ;;  %v61_v5 = vld [vmem:[#allocation5 + $0x10] sm:$0xff]  ;;  %v64_v6 = vld [vmem:[#allocation5 + $0x28] sm:$0xff]  ;;  %s351_s2 = smov [#allocation8]   ;;  %s352_s28 = smov [#allocation9]  }
  0x3a   :  { %v66_v7 = vld [vmem:[#allocation5 + $0x38] sm:$0xff]  ;;  %v205_v8 = vpack.c.bf16 %v61_v5, %v59_v3  ;;  %v63_v10 = vld [vmem:[#allocation5 + $0x20] sm:$0xff]  ;;  %v65_v11 = vld [vmem:[#allocation5 + $0x30] sm:$0xff]  ;;  %v70_v16 = vshrl.u32 %v69_v15, 7  ;;  %s172_s27 = sshll.u32 %s351_s2, 4  ;;  %s184_s29 = sshll.u32 %s352_s28, 4  ;;  %s173_s27 = int_to_ptr.vmem [resolvable:$true] %s172_s27  ;;  %s417_s29 = int_to_ptr.vmem [resolvable:$true] %s184_s29 }
  0x3b   :  { %v207_v9 = vpack.c.bf16 %v66_v7, %v64_v6  ;;  %204 = vmatprep.subr.bf16.mxu0 %v203_v4  ;;  %211 = vmatprep.subr.bf16.mxu1 %v203_v4  ;;  %v209_v12 = vpack.c.bf16 %v65_v11, %v63_v10  ;;  %v57_v13 = vld [vmem:[#allocation2] sm:$0xff]  ;;  %v58_v14 = vld [vmem:[#allocation2 + $0x8] sm:$0xff]  ;;  %v67_v18 = vld [vmem:[#allocation7] sm:$0x3]  ;;  %s291_s30 = scalar_lea.vmem %s173_s27, 256  ;;  %p296_p11 = scmp.lt.s32.totalorder %s173_s27, %s173_s27 }
  0x3c   :  { %206 = vmatpush1.bf16.msra.mxu0 %v205_v8  ;;  %213 = vmatpush1.bf16.msra.mxu1 %v205_v8  ;;  %v71_v17 = vsub.s32 0, %v70_v16  ;;  %v75_v19 = vsub.s32 1, %v70_v16  ;;  %p292_p10 = scmp.ne.s32.totalorder %s173_s27, %s291_s30  ;;  %p297_p12 = scmp.lt.s32.totalorder %s291_s30, %s291_s30 }
  0x3d   :  { %208 = vmatprep.subr.bf16.mxu0 %v207_v9  ;;  %212 = vmatprep.subr.bf16.mxu1 %v207_v9 }
  0x3e   :  { %v72_v20 = vrot.slane %v67_v18, %v71_v17  ;;  %v76_v21 = vrot.slane %v67_v18, %v75_v19  ;;  %p298_p13 = por %p297_p12, %p296_p11 }
  0x40   :  { %210 = vmatpush1.bf16.msra.mxu0 %v209_v12  ;;  %214 = vmatpush1.bf16.msra.mxu1 %v209_v12  ;;  %p299_p0 = pnand %p298_p13, %p292_p10 }
  0x43   :  { %201 = vmatmul.mubr.msk.f32.vlgmr.msra.gmra.mrb[0].mxu0 %vm79_vm0, %v57_v13  ;;  %202 = vmatmul.mubr.msk.f32.vlgmr.msra.gmra.mrb[0].mxu1 %vm79_vm0, %v58_v14 }
 0x116   :  { %v152_v22 = vpop.f32.mrb[0].mxu0  ;;  %v158_v23 = vpop.f32.mrb[0].mxu1 }
 0x117   :  { %v153_v24 = vadd.f32 %v152_v22, %v72_v20  ;;  %v159_v25 = vadd.f32 %v158_v23, %v72_v20  ;;  %v154_v26 = vpop.f32.mrb[1].mxu0  ;;  %v160_v27 = vpop.f32.mrb[1].mxu1 }
 0x118   :  { %v155_v28 = vadd.f32 %v154_v26, %v76_v21  ;;  %v161_v29 = vadd.f32 %v160_v27, %v76_v21 }
 0x119   :  { %163 = vst [vmem:[#allocation8] sm:$0xff] %v153_v24  ;;  %164 = vst [vmem:[#allocation8 + $0x8] sm:$0xff] %v159_v25 }
 0x11a   :  { %165 = vst [vmem:[#allocation9] sm:$0xff] %v155_v28  ;;  %166 = vst [vmem:[#allocation9 + $0x8] sm:$0xff] %v161_v29 }
 0x11b   :  { %302 = shalt.err (!%p299_p0)
}
 0x11c   :  { %s303_s7 = scalar_lea.hbm %s457_s3, 256 }
 0x11d   :  { %p304_p1 = scmp.ne.s32.totalorder %s457_s3, %s303_s7  ;;  %p307_p2 = scmp.lt.u32.totalorder %s303_s7, %s457_s3 }
 0x11f   :  { %p309_p3 = pnand %p307_p2, %p304_p1 }
 0x121   :  { %312 = shalt.err (!%p309_p3)
}
 0x122   :  { %178 = dma.vmem_to_hbm [thread:$0]  %s173_s27, 256, %s457_s3, [#allocation4], %s347_s1, %s347_s1, %s348_s13  }
 0x123   :  { %s313_s15 = scalar_lea.vmem %s417_s29, 256  ;;  %p318_p5 = scmp.lt.s32.totalorder %s417_s29, %s417_s29 }
 0x124   :  { %p314_p4 = scmp.ne.s32.totalorder %s417_s29, %s313_s15  ;;  %p319_p6 = scmp.lt.s32.totalorder %s313_s15, %s313_s15 }
 0x126   :  { %p320_p7 = por %p319_p6, %p318_p5 }
 0x128   :  { %p321_p8 = pnand %p320_p7, %p314_p4 }
 0x12a   :  { %324 = shalt.err (!%p321_p8)
}
 0x12b   :  { %s325_s18 = scalar_lea.hbm %s458_s4, 256 }
 0x12c   :  { %p326_p9 = scmp.ne.s32.totalorder %s458_s4, %s325_s18  ;;  %p329_p10 = scmp.lt.u32.totalorder %s325_s18, %s458_s4 }
 0x12e   :  { %p331_p11 = pnand %p329_p10, %p326_p9 }
 0x130   :  { %334 = shalt.err (!%p331_p11)
}
 0x131   :  { %190 = dma.vmem_to_hbm [thread:$0]  %s417_s29, 256, %s458_s4, [#allocation10], %s347_s1, %s347_s1, %s348_s13  }
 0x132   :  { %339 = dma.done.wait [#allocation4], 256  }
 0x133   :  { %340 = vsyncadd [#allocation4], 4294967040 }
 0x134   :  { %341 = dma.done.wait [#allocation10], 256  }
 0x135   :  { %342 = vsyncadd [#allocation10], 4294967040 }
 0x136   :  { %197 = vsyncpa [#allocation3], 1 }
 0x137   :  { %198 = vsyncpa [#allocation6], 1 }
 0x138   :  { %199 = vsyncpa [#allocation4], 1 }
 0x139   :  { %200 = vsyncpa [#allocation10], 1 }

</bundles_post_ra>
